<compile_context>
chip_gen: v7x
topology: tpu7x:2x2x1
jax: 0.10.0
libtpu: 0.0.40
codegen_flags: <defaults>
</compile_context>

<pallas_src>
import functools

import jax
import jax.numpy as jnp
import numpy as np
from jax import lax
from jax.experimental import pallas as pl
from jax.experimental.pallas import tpu as pltpu

# Safe on v5e/v6e (128 MiB physical VMEM) and v7x (64 MiB physical VMEM).
_VMEM_LIMIT_BYTES = 48 * 1024 * 1024


def _ru(x, m):
    return (x + m - 1) // m * m


def _pick_tile(dim, cands):
    for c in cands:
        if dim % c == 0:
            return c
    return cands[-1]


# -----------------------------------------------------------------------------
# Pallas kernel #1: tiled GEMM (bf16 x bf16 -> f32) + bias + optional LeakyReLU
# (used only for the stride-2 extractor convs via a small NHWC im2col)
# -----------------------------------------------------------------------------
def _mm_kernel(a_ref, b_ref, bias_ref, o_ref, *, act):
    @pl.when(pl.program_id(2) == 0)
    def _():
        o_ref[...] = jnp.zeros_like(o_ref)

    # f32 accumulation directly in the resident output block (no scratch).
    o_ref[...] += jnp.dot(a_ref[...], b_ref[...],
                          preferred_element_type=jnp.float32)

    @pl.when(pl.program_id(2) == pl.num_programs(2) - 1)
    def _():
        r = o_ref[...] + bias_ref[...]
        if act:
            r = jnp.where(r >= 0, r, 0.1 * r)
        o_ref[...] = r


@functools.lru_cache(maxsize=None)
def _build_matmul(Mp, Kp, Np, act):
    TM = _pick_tile(Mp, (512, 256, 128))
    TN = _pick_tile(Np, (256, 128))
    TK = _pick_tile(Kp, (512, 256, 128))
    return pl.pallas_call(
        functools.partial(_mm_kernel, act=act),
        out_shape=jax.ShapeDtypeStruct((Mp, Np), jnp.float32),
        grid=(Mp // TM, Np // TN, Kp // TK),
        in_specs=[
            pl.BlockSpec((TM, TK), lambda i, j, k: (i, k)),
            pl.BlockSpec((TK, TN), lambda i, j, k: (k, j)),
            pl.BlockSpec((1, TN), lambda i, j, k: (0, j)),
        ],
        out_specs=pl.BlockSpec((TM, TN), lambda i, j, k: (i, j)),
        compiler_params=pltpu.CompilerParams(
            dimension_semantics=("parallel", "parallel", "arbitrary"),
            vmem_limit_bytes=_VMEM_LIMIT_BYTES),
    )


# -----------------------------------------------------------------------------
# Pallas kernel #2: implicit-GEMM stride-1 conv (kh x kw, dilation d), NHWC.
# Reads the padded image once per batch item, unrolls the taps in-kernel,
# bf16 operands -> f32 accumulation, bias + LeakyReLU fused, exact-width output.
# -----------------------------------------------------------------------------
def _conv_s1_kernel(x_ref, w_ref, b_ref, o_ref, *, kh, kw, d, Hout, Wout, act):
    C = x_ref.shape[-1]
    Cout = o_ref.shape[-1]
    coutp = w_ref.shape[-1]
    acc = jnp.zeros((Hout * Wout, coutp), jnp.float32)
    for ki in range(kh):
        for kj in range(kw):
            win = x_ref[0, ki * d:ki * d + Hout, kj * d:kj * d + Wout, :]
            a = win.reshape(Hout * Wout, C).astype(jnp.bfloat16)
            acc = acc + jnp.dot(a, w_ref[ki, kj],
                                preferred_element_type=jnp.float32)
    r = acc[:, :Cout] + b_ref[...]
    if act:
        r = jnp.where(r >= 0, r, 0.1 * r)
    o_ref[0] = r.reshape(Hout, Wout, Cout)


@functools.lru_cache(maxsize=None)
def _build_conv_s1(N, Hp, Wp, C, kh, kw, d, Cout, Coutp, act):
    Hout = Hp - d * (kh - 1)
    Wout = Wp - d * (kw - 1)
    return pl.pallas_call(
        functools.partial(_conv_s1_kernel, kh=kh, kw=kw, d=d,
                          Hout=Hout, Wout=Wout, act=act),
        out_shape=jax.ShapeDtypeStruct((N, Hout, Wout, Cout), jnp.float32),
        grid=(N,),
        in_specs=[
            pl.BlockSpec((1, Hp, Wp, C), lambda n: (n, 0, 0, 0)),
            pl.BlockSpec((kh, kw, C, Coutp), lambda n: (0, 0, 0, 0)),
            pl.BlockSpec((1, Cout), lambda n: (0, 0)),
        ],
        out_specs=pl.BlockSpec((1, Hout, Wout, Cout), lambda n: (n, 0, 0, 0)),
        compiler_params=pltpu.CompilerParams(
            dimension_semantics=("parallel",),
            vmem_limit_bytes=_VMEM_LIMIT_BYTES),
    )


# -----------------------------------------------------------------------------
# Pallas kernel #3: correlation (81-channel cost volume) + fused LeakyReLU(0.1).
# One padded copy of `second`; all 81 displacements computed in-kernel.
# -----------------------------------------------------------------------------
def _corr_kernel(f_ref, s_ref, o_ref, *, H, W, inv_c):
    f = f_ref[0]                                   # (H, W, C)
    for dy in range(9):
        for dx in range(9):
            s = s_ref[0, dy:dy + H, dx:dx + W, :]
            m = jnp.sum(f * s, axis=-1) * inv_c    # (H, W)
            o_ref[0, dy * 9 + dx] = jnp.where(m >= 0, m, 0.1 * m)


@functools.lru_cache(maxsize=None)
def _build_corr(N, H, W, C):
    return pl.pallas_call(
        functools.partial(_corr_kernel, H=H, W=W, inv_c=1.0 / C),
        out_shape=jax.ShapeDtypeStruct((N, 81, H, W), jnp.float32),
        grid=(N,),
        in_specs=[
            pl.BlockSpec((1, H, W, C), lambda n: (n, 0, 0, 0)),
            pl.BlockSpec((1, H + 8, W + 8, C), lambda n: (n, 0, 0, 0)),
        ],
        out_specs=pl.BlockSpec((1, 81, H, W), lambda n: (n, 0, 0, 0)),
        compiler_params=pltpu.CompilerParams(
            dimension_semantics=("parallel",),
            vmem_limit_bytes=_VMEM_LIMIT_BYTES),
    )


def correlation(first, second):
    """FunctionCorrelation (max disp 4, mean over C) + fused LeakyReLU.

    first/second: (N, H, W, C) NHWC.  Returns (N, H, W, 81).
    """
    N, H, W, C = first.shape
    sp = jnp.pad(second, ((0, 0), (4, 4), (4, 4), (0, 0)))
    vol = _build_corr(N, H, W, C)(first, sp)       # (N, 81, H, W)
    # TODO(synk): emit the volume NHWC (lane-dense 81 axis) directly in-kernel
    # to drop this small transpose.
    return jnp.transpose(vol, (0, 2, 3, 1))


# -----------------------------------------------------------------------------
# Conv wrappers (NHWC)
# -----------------------------------------------------------------------------
def _conv_s1_core(xp, p, dilation, act):
    N, Hp, Wp, C = xp.shape
    kh, kw = p['k']
    coutp = p['w'].shape[-1]
    fn = _build_conv_s1(N, Hp, Wp, C, kh, kw, dilation, p['cout'], coutp, act)
    return fn(xp, p['w'], p['b'])


def _conv_im2col(x, p, padding, dilation, act):
    N, H, W, C = x.shape
    kh, kw = p['k']
    stride = p['stride']
    Hout = (H + 2 * padding - dilation * (kh - 1) - 1) // stride + 1
    Wout = (W + 2 * padding - dilation * (kw - 1) - 1) // stride + 1
    xp = jnp.pad(x, ((0, 0), (padding, padding), (padding, padding), (0, 0)))
    cols = []
    for ki in range(kh):
        for kj in range(kw):
            ys, xs = ki * dilation, kj * dilation
            cols.append(xp[:, ys:ys + stride * (Hout - 1) + 1:stride,
                           xs:xs + stride * (Wout - 1) + 1:stride, :])
    col = jnp.concatenate(cols, axis=-1).reshape(N * Hout * Wout, kh * kw * C)
    M, K = col.shape
    Kp, Np = p['w'].shape
    Mp = _ru(M, 128)
    ap = jnp.pad(col, ((0, Mp - M), (0, Kp - K))).astype(jnp.bfloat16)
    out = _build_matmul(Mp, Kp, Np, act)(ap, p['w'], p['b'])
    return out[:M, :p['cout']].reshape(N, Hout, Wout, p['cout'])


def conv2d(x, p, padding=1, dilation=1, act=True):
    """PyTorch-semantics Conv2d on NHWC activations."""
    if p['stride'] == 1:
        xp = jnp.pad(x, ((0, 0), (padding, padding),
                         (padding, padding), (0, 0)))
        return _conv_s1_core(xp, p, dilation, act)
    # TODO(synk): the 12 stride-2 extractor convs still use an explicit (small)
    # im2col GEMM; a strided-window implicit kernel would remove that copy too.
    return _conv_im2col(x, p, padding, dilation, act)


def conv_transpose2d(x, p):
    """ConvTranspose2d(k=4, s=2, p=1) == conv(zero-upsampled x, flipped w, pad=2)."""
    zero = jnp.zeros((), x.dtype)
    up = lax.pad(x, zero, ((0, 0, 0), (2, 2, 1), (2, 2, 1), (0, 0, 0)))
    return _conv_s1_core(up, p, dilation=1, act=False)


# -----------------------------------------------------------------------------
# Backward warping (grid_sample bilinear, padding_mode='zeros').  The grid is
# built exactly like the reference (linspace(-1,1,*) + flow/((size-1)/2)) and
# sampled with the current torch grid_sample default (align_corners=False).
# TODO(synk): data-dependent bilinear gather stays in plain JAX (no clean
# rectangular-BlockSpec Pallas equivalent).
# -----------------------------------------------------------------------------
def _grid_sample_bilinear_zeros(inp, gx, gy):
    N, H, W, C = inp.shape
    ix = ((gx + 1.0) * W - 1.0) * 0.5
    iy = ((gy + 1.0) * H - 1.0) * 0.5
    x0 = jnp.floor(ix)
    y0 = jnp.floor(iy)
    x1 = x0 + 1.0
    y1 = y0 + 1.0
    w00 = (x1 - ix) * (y1 - iy)
    w01 = (ix - x0) * (y1 - iy)
    w10 = (x1 - ix) * (iy - y0)
    w11 = (ix - x0) * (iy - y0)
    flat = inp.reshape(N, H * W, C)

    def gather(xi, yi):
        valid = (xi >= 0) & (xi <= W - 1) & (yi >= 0) & (yi <= H - 1)
        xc = jnp.clip(xi, 0, W - 1).astype(jnp.int32)
        yc = jnp.clip(yi, 0, H - 1).astype(jnp.int32)
        idx = (yc * W + xc).reshape(N, H * W, 1)
        g = jnp.take_along_axis(flat, jnp.broadcast_to(idx, (N, H * W, C)),
                                axis=1).reshape(N, H, W, C)
        return g * valid.astype(inp.dtype)[..., None]

    return (gather(x0, y0) * w00[..., None] + gather(x1, y0) * w01[..., None]
            + gather(x0, y1) * w10[..., None] + gather(x1, y1) * w11[..., None])


def backward_warp(x, flow):
    """x: (N,H,W,C), flow: (N,H,W,2) with [...,0]=horizontal, [...,1]=vertical."""
    N, H, W, C = x.shape
    inp = jnp.concatenate([x, jnp.ones((N, H, W, 1), x.dtype)], axis=-1)
    gx = jnp.linspace(-1.0, 1.0, W, dtype=jnp.float32)[None, None, :] \
        + flow[..., 0] / ((W - 1.0) / 2.0)
    gy = jnp.linspace(-1.0, 1.0, H, dtype=jnp.float32)[None, :, None] \
        + flow[..., 1] / ((H - 1.0) / 2.0)
    sampled = _grid_sample_bilinear_zeros(inp, gx, gy)
    mask = jnp.where(sampled[..., -1:] > 0.999, 1.0, 0.0)
    return sampled[..., :-1] * mask


# -----------------------------------------------------------------------------
# Deterministic parameter initialization (synthetic weights, no checkpoint).
# Weights are transposed / padded / cast to bf16 ONCE at build time.
# -----------------------------------------------------------------------------
class KeyGen:
    def __init__(self, key):
        self.key = key

    def __call__(self):
        self.key, sub = jax.random.split(self.key)
        return sub


def _prep_conv(w, b, stride):
    """w: (Cout, Cin, kh, kw) torch layout, b: (Cout,)."""
    cout, cin, kh, kw = w.shape
    wt = jnp.transpose(w, (2, 3, 1, 0))              # (kh, kw, Cin, Cout)
    if stride == 1:
        coutp = _ru(cout, 128)
        wp = jnp.pad(wt, ((0, 0), (0, 0), (0, 0),
                          (0, coutp - cout))).astype(jnp.bfloat16)
        bp = b.reshape(1, cout)
    else:
        K = kh * kw * cin
        Kp, Np = _ru(K, 128), _ru(cout, 128)
        wp = jnp.pad(wt.reshape(K, cout),
                     ((0, Kp - K), (0, Np - cout))).astype(jnp.bfloat16)
        bp = jnp.pad(b, (0, Np - cout)).reshape(1, Np)
    return {'w': wp, 'b': bp, 'cout': cout, 'k': (kh, kw), 'stride': stride}


def conv_params(kg, cin, cout, k=3, stride=1):
    s = 1.0 / np.sqrt(cin * k * k)
    w = jax.random.uniform(kg(), (cout, cin, k, k), jnp.float32, -s, s)
    b = jax.random.uniform(kg(), (cout,), jnp.float32, -s, s)
    return _prep_conv(w, b, stride)


def convT_params(kg, cin, cout, k=4):
    s = 1.0 / np.sqrt(cin * k * k)
    w = jax.random.uniform(kg(), (cin, cout, k, k), jnp.float32, -s, s)
    b = jax.random.uniform(kg(), (cout,), jnp.float32, -s, s)
    wc = jnp.flip(w, axis=(2, 3)).transpose(1, 0, 2, 3)   # equivalent conv weight
    return _prep_conv(wc, b, stride=1)


_CURRENT = {2: 81 + 32 + 2 + 2, 3: 81 + 64 + 2 + 2, 4: 81 + 96 + 2 + 2,
            5: 81 + 128 + 2 + 2, 6: 81}


def make_extractor_params(kg):
    chans = [(3, 16), (16, 32), (32, 64), (64, 96), (96, 128), (128, 196)]
    blocks = []
    for cin, cout in chans:
        blocks.append([conv_params(kg, cin, cout, stride=2),
                       conv_params(kg, cout, cout, stride=1),
                       conv_params(kg, cout, cout, stride=1)])
    return blocks


def make_decoder_params(kg, level):
    cur = _CURRENT[level]
    p = {}
    if level < 6:
        prev = _CURRENT[level + 1]
        p['upflow'] = convT_params(kg, 2, 2)
        p['upfeat'] = convT_params(kg, prev + 128 + 128 + 96 + 64 + 32, 2)
    p['one'] = conv_params(kg, cur, 128)
    p['two'] = conv_params(kg, cur + 128, 128)
    p['thr'] = conv_params(kg, cur + 256, 96)
    p['fou'] = conv_params(kg, cur + 352, 64)
    p['fiv'] = conv_params(kg, cur + 416, 32)
    p['six'] = conv_params(kg, cur + 448, 2)
    return p


def make_refiner_params(kg):
    spec = [(565, 128, 1), (128, 128, 2), (128, 128, 4), (128, 96, 8),
            (96, 64, 16), (64, 32, 1), (32, 2, 1)]
    return [(conv_params(kg, cin, cout), dil) for cin, cout, dil in spec]


def build_params(kg):
    return {
        'extractor': make_extractor_params(kg),
        'dec6': make_decoder_params(kg, 6),
        'dec5': make_decoder_params(kg, 5),
        'dec4': make_decoder_params(kg, 4),
        'dec3': make_decoder_params(kg, 3),
        'dec2': make_decoder_params(kg, 2),
        'refiner': make_refiner_params(kg),
    }


# -----------------------------------------------------------------------------
# Network forward (PWC-Net), NHWC internally.
# -----------------------------------------------------------------------------
def extractor_forward(blocks, x):
    feats = []
    for block in blocks:
        for p in block:
            x = conv2d(x, p, padding=1, dilation=1, act=True)
        feats.append(x)
    return feats


def decoder_forward(p, first, second, prev, dbl_backward):
    if prev is None:
        feat = correlation(first, second)            # leaky fused in kernel
    else:
        flow = conv_transpose2d(prev['flow'], p['upflow'])
        feat_up = conv_transpose2d(prev['feat'], p['upfeat'])
        warped = backward_warp(second, flow * dbl_backward)
        volume = correlation(first, warped)
        # TODO(synk): the growing concat chain below still copies the feature
        # tensor through HBM each step; a preallocated slab + aliased writes
        # would remove that traffic.
        feat = jnp.concatenate([volume, first, flow, feat_up], axis=-1)

    feat = jnp.concatenate([conv2d(feat, p['one']), feat], axis=-1)
    feat = jnp.concatenate([conv2d(feat, p['two']), feat], axis=-1)
    feat = jnp.concatenate([conv2d(feat, p['thr']), feat], axis=-1)
    feat = jnp.concatenate([conv2d(feat, p['fou']), feat], axis=-1)
    feat = jnp.concatenate([conv2d(feat, p['fiv']), feat], axis=-1)
    flow = conv2d(feat, p['six'], act=False)
    return {'flow': flow, 'feat': feat}


def refiner_forward(p, x):
    n = len(p)
    for i, (pc, dil) in enumerate(p):
        x = conv2d(x, pc, padding=dil, dilation=dil, act=(i < n - 1))
    return x


def network_forward(params, tensor_first, tensor_second):
    """Inputs/outputs NCHW (PyTorch convention); compute is NHWC internally."""
    x1 = jnp.transpose(tensor_first, (0, 2, 3, 1))
    x2 = jnp.transpose(tensor_second, (0, 2, 3, 1))
    f1 = extractor_forward(params['extractor'], x1)
    f2 = extractor_forward(params['extractor'], x2)
    est = decoder_forward(params['dec6'], f1[-1], f2[-1], None, None)
    est = decoder_forward(params['dec5'], f1[-2], f2[-2], est, 0.625)
    est = decoder_forward(params['dec4'], f1[-3], f2[-3], est, 1.25)
    est = decoder_forward(params['dec3'], f1[-4], f2[-4], est, 2.5)
    est = decoder_forward(params['dec2'], f1[-5], f2[-5], est, 5.0)
    flow = est['flow'] + refiner_forward(params['refiner'], est['feat'])
    return jnp.transpose(flow, (0, 3, 1, 2))


# -----------------------------------------------------------------------------
if __name__ == "__main__":
    kg = KeyGen(jax.random.PRNGKey(0))
    params = build_params(kg)

    B, H, W = 2, 64, 64
    tensor_first = jax.random.uniform(kg(), (B, 3, H, W), jnp.float32)
    tensor_second = jax.random.uniform(kg(), (B, 3, H, W), jnp.float32)

    out = network_forward(params, tensor_first, tensor_second)
    out = jax.block_until_ready(out)

    assert out.shape == (B, 2, H // 4, W // 4), out.shape
    assert bool(jnp.all(jnp.isfinite(out)))
    print("KERNEL_OK")
</pallas_src>

<mosaic_0001>
module attributes {stable_mosaic.version = 11 : i64} {
  func.func @_mm_kernel(%arg0: i32, %arg1: i32, %arg2: i32, %arg3: memref<512x128xbf16, #tpu.memory_space<vmem>>, %arg4: memref<128x128xbf16, #tpu.memory_space<vmem>>, %arg5: memref<1x128xf32, #tpu.memory_space<vmem>>, %arg6: memref<512x128xf32, #tpu.memory_space<vmem>>) attributes {dimension_semantics = [#tpu.dimension_semantics<parallel>, #tpu.dimension_semantics<parallel>, #tpu.dimension_semantics<arbitrary>], iteration_bounds = array<i64: 4, 1, 1>, scalar_prefetch = 0 : i64, scratch_operands = 0 : i64, tpu.core_type = #tpu.core_type<tc>, window_params = [{transform_indices = @transform_0, window_bounds = array<i64: 512, 128>}, {transform_indices = @transform_1, window_bounds = array<i64: 128, 128>}, {transform_indices = @transform_2, window_bounds = array<i64: 1, 128>}, {transform_indices = @transform_3, window_bounds = array<i64: 512, 128>}]} {
    %c0_i32 = arith.constant 0 : i32
    %0 = arith.cmpi eq, %arg2, %c0_i32 : i32
    %1 = arith.extui %0 : i1 to i32
    %c0_i32_0 = arith.constant 0 : i32
    %2 = arith.cmpi ne, %1, %c0_i32_0 : i32
    scf.if %2 {
      %cst_10 = arith.constant 0.000000e+00 : f32
      %12 = vector.broadcast %cst_10 : f32 to vector<512x128xf32>
      %c0_11 = arith.constant 0 : index
      %c0_12 = arith.constant 0 : index
      %13 = vector.load %arg6[%c0_11, %c0_12] : memref<512x128xf32, #tpu.memory_space<vmem>>, vector<512x128xf32>
      tpu.vector_store %arg6[%c0_11, %c0_12], %12 {strides = array<i32>} : memref<512x128xf32, #tpu.memory_space<vmem>>, vector<512x128xf32>,
    } else {
    }
    %c0 = arith.constant 0 : index
    %c0_1 = arith.constant 0 : index
    %3 = vector.load %arg6[%c0, %c0_1] : memref<512x128xf32, #tpu.memory_space<vmem>>, vector<512x128xf32>
    %c0_2 = arith.constant 0 : index
    %c0_3 = arith.constant 0 : index
    %4 = vector.load %arg3[%c0_2, %c0_3] : memref<512x128xbf16, #tpu.memory_space<vmem>>, vector<512x128xbf16>
    %c0_4 = arith.constant 0 : index
    %c0_5 = arith.constant 0 : index
    %5 = vector.load %arg4[%c0_4, %c0_5] : memref<128x128xbf16, #tpu.memory_space<vmem>>, vector<128x128xbf16>
    %cst = arith.constant dense<0.000000e+00> : vector<512x128xf32>
    %6 = tpu.matmul %4, %5, %cst {dimension_numbers = #tpu.dot_dimension_numbers<[1], [0], [0], [1], [0, 0, 1, 1], [], []>} : vector<512x128xbf16>, vector<128x128xbf16>, vector<512x128xf32> -> vector<512x128xf32>
    %7 = arith.addf %3, %6 : vector<512x128xf32>
    %c0_6 = arith.constant 0 : index
    %c0_7 = arith.constant 0 : index
    %8 = vector.load %arg6[%c0_6, %c0_7] : memref<512x128xf32, #tpu.memory_space<vmem>>, vector<512x128xf32>
    tpu.vector_store %arg6[%c0_6, %c0_7], %7 {strides = array<i32>} : memref<512x128xf32, #tpu.memory_space<vmem>>, vector<512x128xf32>,
    %c0_i32_8 = arith.constant 0 : i32
    %9 = arith.cmpi eq, %arg2, %c0_i32_8 : i32
    %10 = arith.extui %9 : i1 to i32
    %c0_i32_9 = arith.constant 0 : i32
    %11 = arith.cmpi ne, %10, %c0_i32_9 : i32
    scf.if %11 {
      %c0_10 = arith.constant 0 : index
      %c0_11 = arith.constant 0 : index
      %12 = vector.load %arg6[%c0_10, %c0_11] : memref<512x128xf32, #tpu.memory_space<vmem>>, vector<512x128xf32>
      %c0_12 = arith.constant 0 : index
      %c0_13 = arith.constant 0 : index
      %13 = vector.load %arg5[%c0_12, %c0_13] : memref<1x128xf32, #tpu.memory_space<vmem>>, vector<1x128xf32>
      %14 = vector.broadcast %13 : vector<1x128xf32> to vector<512x128xf32>
      %15 = arith.addf %12, %14 : vector<512x128xf32>
      %cst_14 = arith.constant 0.000000e+00 : f32
      %16 = vector.broadcast %cst_14 : f32 to vector<512x128xf32>
      %17 = arith.cmpf oge, %15, %16 : vector<512x128xf32>
      %cst_15 = arith.constant 1.000000e-01 : f32
      %18 = vector.broadcast %cst_15 : f32 to vector<512x128xf32>
      %19 = arith.mulf %18, %15 : vector<512x128xf32>
      %20 = arith.select %17, %15, %19 : vector<512x128xi1>, vector<512x128xf32>
      %c0_16 = arith.constant 0 : index
      %c0_17 = arith.constant 0 : index
      %21 = vector.load %arg6[%c0_16, %c0_17] : memref<512x128xf32, #tpu.memory_space<vmem>>, vector<512x128xf32>
      tpu.vector_store %arg6[%c0_16, %c0_17], %20 {strides = array<i32>} : memref<512x128xf32, #tpu.memory_space<vmem>>, vector<512x128xf32>,
    } else {
    }
    return
  }
  func.func @transform_0(%arg0: i32, %arg1: i32, %arg2: i32) -> (i32, i32) {
    %c0_i32 = arith.constant 0 : i32
    return %arg0, %arg2 : i32, i32
  }
  func.func @transform_1(%arg0: i32, %arg1: i32, %arg2: i32) -> (i32, i32) {
    %c0_i32 = arith.constant 0 : i32
    return %arg2, %arg1 : i32, i32
  }
  func.func @transform_2(%arg0: i32, %arg1: i32, %arg2: i32) -> (i32, i32) {
    %c0_i32 = arith.constant 0 : i32
    %c0_i32_0 = arith.constant 0 : i32
    return %c0_i32, %arg1 : i32, i32
  }
  func.func @transform_3(%arg0: i32, %arg1: i32, %arg2: i32) -> (i32, i32) {
    %c0_i32 = arith.constant 0 : i32
    return %arg0, %arg1 : i32, i32
  }
}

</mosaic_0001>

<bundles_post_ra>
// kernel: tpu_custom_call.1
= control target key start
LH: loop header
LB: loop body
LE: loop exit
PB: predicated region body
PF: predicated region fallthrough
CT: control target
= control target key end

     0   :  { %8 = vsyncpa [#allocation3], 0  ;;  %s2588_s0 = inlined_call_operand.hbm [shape: bf16[2048,128], index: 0, kind: input, shape index: {}]   ;;  %s2589_s1 = inlined_call_operand.hbm [shape: bf16[128,128], index: 1, kind: input, shape index: {}]   ;;  %s2590_s2 = inlined_call_operand.vmem [shape: f32[1,128], index: 2, kind: input, shape index: {}]   ;;  %s2591_s3 = inlined_call_operand.hbm [shape: f32[2048,128], index: 3, kind: output, shape index: {}]  }
   0x1   :  { %10 = vsyncpa [#allocation3 + $0x1], 0 }
   0x2   :  { %11 = vsyncpa [#allocation6], 0 }
   0x3   :  { %12 = vsyncpa [#allocation4], 0 }
   0x4   :  { %14 = vsyncpa [#allocation4 + $0x1], 0  ;;  %s2137_s12 = smov 0   ;;  %s2139_s13 = smov 0  }
   0x5   :  { %s2141_s14 = smov 0   ;;  %s2143_s15 = smov 0  }
   0x6   :  { %s2145_s16 = smov 0   ;;  %s2147_s17 = smov 0  }
   0x7 LB: > { %s1649_s18 = sadd.s32 4294967295, %s2108_s17   ;;  %s1650_s19 = sadd.s32 4294967294, %s2108_s17   ;;  %s2108_s17 = sphi %s2147_s17, %s20_s17   ;;  %s2104_s16 = sphi %s2145_s16, %s2614_s16   ;;  %s2100_s15 = sphi %s2143_s15, %s2613_s15   ;;  %s2096_s14 = sphi %s2141_s14, %s2612_s14   ;;  %s2092_s13 = sphi %s2139_s13, %s2611_s13   ;;  %s2088_s12 = sphi %s2137_s12, %s2610_s12  }
   0x8   : > { %p61_p0 = scmp.ne.s32.totalorder %s2092_s13, %s2088_s12  ;;  %p2171_p1 = scmp.eq.s32.totalorder %s1649_s18, 0 }
   0x9   : > { %p2175_p2 = scmp.eq.s32.totalorder %s1649_s18, 3  ;;  %p147_p3 = scmp.eq.s32.totalorder %s1650_s19, 3 }
   0xa   : > { %s2596_s20 = scalar_select %p2171_p1, 1, 0 }
   0xb   : > { %s2597_s21 = scalar_select %p2175_p2, 1, 0 }
   0xc   : > { %p2181_p4 = por %p2171_p1, %p61_p0  ;;  %p1651_p5 = scmp.ge.s32.totalorder %s2108_s17, 1 }
   0xd   : > { %p2186_p6 = por %p147_p3, %p61_p0  ;;  %p154_p7 = scmp.lt.s32.totalorder %s2108_s17, 5 }
   0xe   : > { %s2598_s22 = scalar_select %p2181_p4, 1, 0 }
   0xf   : > { %s2599_s23 = scalar_select %p2186_p6, 1, 0 }
  0x10   : > { %p2191_p8 = pnand %p1651_p5, %p154_p7  ;;  %s2110_s25 = smov [#allocation5]  }
  0x11   : > { %s170_s26 = sshll.u32 %s2110_s25, 4  ;;  %s39_s28 = sadd.s32 1, %s2104_s16  ;;  %s171_s26 = int_to_ptr.vmem [resolvable:$true] %s170_s26 }
  0x12   : > { %s2600_s24 = scalar_select %p2191_p8, 1, 0 }
  0x13   : > { %p1854_p9 = pneg %p2191_p8  ;;  %s1964_s4 = scalar_lea.hbm %s2589_s1, 1024 }
  0x14   : > { %p1965_p11 = scmp.ne.s32.totalorder %s2589_s1, %s1964_s4  ;;  %p1971_p3 = scmp.lt.u32.totalorder %s1964_s4, %s2589_s1 }
  0x15   : > { %p2199_p10 = pnand %p1854_p9, %p2171_p1 }
  0x17   : > { %p1966_p12 = pneg %p2199_p10 }
  0x19   : > { %p1967_p13 = pnand %p1966_p12, %p1965_p11 }
  0x1b   : > { %p1968_p0 = pneg %p1967_p13 }
  0x1d   : > { %p1973_p5 = pnand %p1971_p3, %p1968_p0 }
  0x1f   : > { %1976 = shalt.err (!%p1973_p5)
}
  0x20   : > { %s1977_s9 = scalar_lea.vmem %s171_s26, 1024  ;;  %p1985_p1 = scmp.lt.s32.totalorder %s171_s26, %s171_s26 }
  0x21   : > { %p1978_p7 = scmp.ne.s32.totalorder %s171_s26, %s1977_s9  ;;  %p1986_p4 = scmp.lt.s32.totalorder %s1977_s9, %s1977_s9 }
  0x23   : > { %p1980_p9 = pnand %p1978_p7, %p1966_p12  ;;  %p1987_p8 = por %p1986_p4, %p1985_p1 }
  0x25   : > { %p1981_p6 = pneg %p1980_p9 }
  0x27   : > { %p1988_p2 = pnand %p1987_p8, %p1981_p6 }
  0x29   : > { %1991 = shalt.err (!%p1988_p2)
}
  0x2a   : > { %s2111_s10 = smov 64   ;;  %s2112_s11 = smov 4  }
  0x2b   : > { %1857 = dma.hbm_to_vmem [thread:$0]  (!%p2199_p10), %s2589_s1, 1024, %s171_s26, [#allocation6], %s2111_s10, %s2111_s10, %s2112_s11  }
  0x2c   : > { %p41_p1 = scmp.ge.s32.totalorder %s39_s28, 4  ;;  %s48_s25 = sadd.s32 1, %s2096_s14 }
  0x2d   : > { %p55_p2 = scmp.ne.s32.totalorder %s2096_s14, %s2092_s13  ;;  %p56_p4 = scmp.eq.s32.totalorder %s2108_s17, 0 }
  0x2e   : > { %s2616_s28 = smov (%p41_p1, %s39_s28), 0  ;;  %p2603_p8 = scmp.ne.s32.totalorder %s2597_s21, 0 }
  0x2f   : > { %p2229_p6 = por %p56_p4, %p55_p2  ;;  %s43_s30 = ssub.s32 %s2104_s16, %s2616_s28 }
  0x30   : > { %p2235_p11 = por %p2603_p8, %p55_p2  ;;  %p1867_p12 = scmp.lt.s32.totalorder %s2108_s17, 4 }
  0x31   : > { %p46_p10 = scmp.eq.s32.totalorder %s43_s30, 0  ;;  %s190_s26 = sand.u32 1, %s2096_s14  }
  0x32   : > { %s1655_s4 = sshll.u32 %s190_s26, 8  ;;  %s1708_s6 = sshll.u32 %s2104_s16, 12 }
  0x33   : > { %s2244_s5 = scalar_select %p46_p10, %s2096_s14, %s48_s25  }
  0x34   : > { %s2250_s9 = scalar_lea.hbm %s2588_s0, %s1708_s6  ;;  %s194_s21 = scalar_lea.vmem [#allocation2], %s1655_s4 }
  0x35   : > { %s202_s18 = sshll.u32 %s194_s21, 4  ;;  %p2256_p13 = pnand %p1867_p12, %p2229_p6  ;;  %s2252_s18 = int_to_ptr.vmem [resolvable:$true] %s202_s18 }
  0x36   : > { %s2260_s25 = scalar_lea.sflag [#allocation3], %s190_s26  ;;  %s1992_s30 = scalar_lea.hbm %s2250_s9, 4096 }
  0x37   : > { %p1993_p0 = scmp.ne.s32.totalorder %s2250_s9, %s1992_s30  ;;  %p1994_p3 = pneg %p2256_p13 }
  0x38   : > { %s1997_s29 = scalar_lea.hbm %s2588_s0, 16384  ;;  %p1998_p9 = scmp.lt.u32.totalorder %s2250_s9, %s2588_s0 }
  0x39   : > { %p1995_p5 = pnand %p1994_p3, %p1993_p0  ;;  %p1999_p1 = scmp.lt.u32.totalorder %s1997_s29, %s1992_s30 }
  0x3a   : > { %p2001_p4 = scmp.lt.u32.totalorder %s1992_s30, %s2250_s9 }
  0x3b   : > { %p1996_p7 = pneg %p1995_p5  ;;  %p2000_p2 = por %p1999_p1, %p1998_p9 }
  0x3d   : > { %p2002_p6 = por %p2001_p4, %p2000_p2 }
  0x3f   : > { %p2003_p8 = pnand %p2002_p6, %p1996_p7 }
  0x41   : > { %2006 = shalt.err (!%p2003_p8)
}
  0x42   : > { %s2007_s26 = scalar_lea.vmem %s2252_s18, 4096  ;;  %s2113_s21 = smov [#allocation2]  }
  0x43   : > { %p2008_p12 = scmp.ne.s32.totalorder %s2252_s18, %s2007_s26  ;;  %s2012_s4 = sshll.u32 %s2113_s21, 4  ;;  %s2013_s4 = int_to_ptr.vmem [resolvable:$false] %s2012_s4 }
  0x44   : > { %s2014_s6 = scalar_lea.vmem %s2013_s4, 8192  ;;  %p2015_p5 = scmp.lt.s32.totalorder %s2252_s18, %s2013_s4 }
  0x45   : > { %p2010_p10 = pnand %p2008_p12, %p1994_p3  ;;  %p2016_p9 = scmp.lt.s32.totalorder %s2014_s6, %s2007_s26 }
  0x47   : > { %p2011_p0 = pneg %p2010_p10  ;;  %p2017_p1 = por %p2016_p9, %p2015_p5 }
  0x49   : > { %p2018_p2 = pnand %p2017_p1, %p2011_p0 }
  0x4b   : > { %2021 = shalt.err (!%p2018_p2)
}
  0x4c   : > { %1861 = dma.hbm_to_vmem [thread:$0]  (!%p2256_p13), %s2250_s9, 4096, %s2252_s18, %s2260_s25, %s2111_s10, %s2111_s10, %s2112_s11  }
  0x4d   : > { %p2606_p3 = scmp.ne.s32.totalorder %s2600_s24, 0 }
  0x4e   : > { %s2294_s30 = sand.u32 (!%p2606_p3), 1, %s2092_s13   ;;  %p2607_p7 = scmp.ne.s32.totalorder (!%p2606_p3), %s2598_s22, 0 }
  0x4f   : > { %214 = sbr.rel (%p2606_p3) target bundleno = 419 (0x1a3), region = 32  ;;  %s1659_s29 = sshll.u32 (!%p2606_p3), %s2294_s30, 8 }
  0x50   : > { %s217_s7 = scalar_lea.sflag (!%p2606_p3), [#allocation3], %s2294_s30  ;;  %s2298_s8 = scalar_lea.vmem (!%p2606_p3), [#allocation2], %s1659_s29 }
  0x56   : > { %2075 = dma.done.wait (%p2607_p7), %s217_s7, 4096  }
  0x57   : > { %2077 = vsyncadd (%p2607_p7), %s217_s7, 4294963200  ;;  %p2608_p13 = scmp.ne.s32.totalorder %s2596_s20, 0 }
  0x59   : > { %2079 = dma.done.wait (%p2608_p13), [#allocation6], 1024  }
  0x5a   : > { %2081 = vsyncadd (%p2608_p13), [#allocation6], 4294966272  ;;  %v1924_v0 = vld [vmem:[#allocation5] sm:$0xff]   ;;  %v1925_v1 = vld [vmem:[#allocation5 + $0x8] sm:$0xff]   ;;  %s1661_s24 = sshll.u32 %s2294_s30, 9  ;;  %s1709_s11 = sshll.u32 %s2100_s15, 13 }
  0x5b   : > { %1750 = vmatprep.subr.bf16.mxu0 %v1924_v0  ;;  %1830 = vmatprep.subr.bf16.mxu1 %v1924_v0  ;;  %v1926_v2 = vld [vmem:[#allocation5 + $0x10] sm:$0xff]   ;;  %v1927_v3 = vld [vmem:[#allocation5 + $0x18] sm:$0xff]   ;;  %v1932_v4 = vld [vmem:[%s2298_s8] sm:$0xff]   ;;  %s2352_s10 = scalar_lea.vmem [#allocation7], %s1661_s24  ;;  %s2534_s19 = scalar_lea.hbm %s2591_s3, %s1709_s11 }
  0x5c   : > { %1751 = vmatpush3.bf16.msra.mxu0 %v1924_v0  ;;  %1838 = vmatpush3.bf16.msra.mxu1 %v1924_v0  ;;  %v1933_v5 = vld [vmem:[%s2298_s8 + $0x80] sm:$0xff]   ;;  %v1929_v7 = vld [vmem:[#allocation5 + $0x28] sm:$0xff]   ;;  %v1930_v8 = vld [vmem:[#allocation5 + $0x30] sm:$0xff]   ;;  %s1535_s9 = sshll.u32 %s2352_s10, 4  ;;  %s1521_s25 = scalar_lea.sflag [#allocation4], %s2294_s30  ;;  %s2536_s9 = int_to_ptr.vmem [resolvable:$true] %s1535_s9 }
  0x5d   : > { %1752 = vmatprep.subr.bf16.mxu0 %v1925_v1  ;;  %1831 = vmatprep.subr.bf16.mxu1 %v1925_v1  ;;  %v1928_v6 = vld [vmem:[#allocation5 + $0x20] sm:$0xff]   ;;  %v1931_v9 = vld [vmem:[#allocation5 + $0x38] sm:$0xff]   ;;  %v1934_v10 = vld [vmem:[%s2298_s8 + $0x8] sm:$0xff]   ;;  %s2022_s26 = scalar_lea.vmem %s2536_s9, 8192  ;;  %s2114_s21 = smov [#allocation7]  }
  0x5e   : > { %1766 = vmatprep.mubr.bf16.mxu0 %v1932_v4  ;;  %1798 = vmatprep.mubr.bf16.mxu1 %v1933_v5  ;;  %v1935_v11 = vld [vmem:[%s2298_s8 + $0x88] sm:$0xff]   ;;  %v1936_v12 = vld [vmem:[%s2298_s8 + $0x10] sm:$0xff]   ;;  %v1938_v14 = vld [vmem:[%s2298_s8 + $0x18] sm:$0xff]   ;;  %p2023_p4 = scmp.ne.s32.totalorder %s2536_s9, %s2022_s26  ;;  %s2026_s4 = sshll.u32 %s2114_s21, 4  ;;  %s2027_s4 = int_to_ptr.vmem [resolvable:$false] %s2026_s4 }
  0x5f   : > { %v1937_v13 = vld [vmem:[%s2298_s8 + $0x90] sm:$0xff]   ;;  %v1939_v15 = vld [vmem:[%s2298_s8 + $0x98] sm:$0xff]   ;;  %v1940_v16 = vld [vmem:[%s2298_s8 + $0x20] sm:$0xff]   ;;  %s2028_s6 = scalar_lea.vmem %s2027_s4, 16384  ;;  %p2029_p12 = scmp.lt.s32.totalorder %s2536_s9, %s2027_s4 }
  0x60   : > { %1753 = vmatpush3.bf16.msra.mxu0 %v1925_v1  ;;  %1839 = vmatpush3.bf16.msra.mxu1 %v1925_v1  ;;  %v1941_v17 = vld [vmem:[%s2298_s8 + $0xa0] sm:$0xff]   ;;  %v1942_v18 = vld [vmem:[%s2298_s8 + $0x28] sm:$0xff]   ;;  %v1944_v20 = vld [vmem:[%s2298_s8 + $0x30] sm:$0xff]   ;;  %p2024_p6 = pnand %p2023_p4, %p2235_p11  ;;  %p2030_p10 = scmp.lt.s32.totalorder %s2028_s6, %s2022_s26 }
  0x61   : > { %1754 = vmatprep.subr.bf16.mxu0 %v1926_v2  ;;  %1832 = vmatprep.subr.bf16.mxu1 %v1926_v2  ;;  %v1943_v19 = vld [vmem:[%s2298_s8 + $0xa8] sm:$0xff]   ;;  %v1945_v21 = vld [vmem:[%s2298_s8 + $0xb0] sm:$0xff]   ;;  %v1946_v22 = vld [vmem:[%s2298_s8 + $0x38] sm:$0xff]  }
  0x62   : > { %v1947_v23 = vld [vmem:[%s2298_s8 + $0xb8] sm:$0xff]   ;;  %v1948_v24 = vld [vmem:[%s2298_s8 + $0x40] sm:$0xff]   ;;  %v1950_v26 = vld [vmem:[%s2298_s8 + $0x48] sm:$0xff]   ;;  %p2025_p8 = pneg %p2024_p6  ;;  %p2031_p0 = por %p2030_p10, %p2029_p12 }
  0x63   : > { %v1949_v25 = vld [vmem:[%s2298_s8 + $0xc0] sm:$0xff]   ;;  %v1951_v27 = vld [vmem:[%s2298_s8 + $0xc8] sm:$0xff]   ;;  %v1952_v28 = vld [vmem:[%s2298_s8 + $0x50] sm:$0xff]  }
  0x64   : > { %1755 = vmatpush3.bf16.msra.mxu0 %v1926_v2  ;;  %1840 = vmatpush3.bf16.msra.mxu1 %v1926_v2  ;;  %v1953_v29 = vld [vmem:[%s2298_s8 + $0xd0] sm:$0xff]   ;;  %v1954_v30 = vld [vmem:[%s2298_s8 + $0x58] sm:$0xff]   ;;  %v1956_v32 = vld [vmem:[%s2298_s8 + $0x60] sm:$0xff]   ;;  %p2032_p5 = pnand %p2031_p0, %p2025_p8 }
  0x65   : > { %1756 = vmatprep.subr.bf16.mxu0 %v1927_v3  ;;  %1833 = vmatprep.subr.bf16.mxu1 %v1927_v3  ;;  %v1955_v31 = vld [vmem:[%s2298_s8 + $0xd8] sm:$0xff]   ;;  %v1957_v33 = vld [vmem:[%s2298_s8 + $0xe0] sm:$0xff]   ;;  %v1958_v34 = vld [vmem:[%s2298_s8 + $0x68] sm:$0xff]  }
  0x66   : > { %v1959_v35 = vld [vmem:[%s2298_s8 + $0xe8] sm:$0xff]   ;;  %v1960_v36 = vld [vmem:[%s2298_s8 + $0x70] sm:$0xff]   ;;  %v1962_v38 = vld [vmem:[%s2298_s8 + $0x78] sm:$0xff]  }
  0x67   : > { %v1961_v37 = vld [vmem:[%s2298_s8 + $0xf0] sm:$0xff]   ;;  %v1963_v39 = vld [vmem:[%s2298_s8 + $0xf8] sm:$0xff]   ;;  %v2343_v41 = vld [vmem:[%s2590_s2] ss:$0 sm:$0xff] }
  0x68   : > { %1757 = vmatpush3.bf16.msra.mxu0 %v1927_v3  ;;  %1841 = vmatpush3.bf16.msra.mxu1 %v1927_v3 }
  0x69   : > { %1758 = vmatprep.subr.bf16.mxu0 %v1928_v6  ;;  %1834 = vmatprep.subr.bf16.mxu1 %v1928_v6 }
  0x6c   : > { %1759 = vmatpush3.bf16.msra.mxu0 %v1928_v6  ;;  %1842 = vmatpush3.bf16.msra.mxu1 %v1928_v6 }
  0x6d   : > { %1760 = vmatprep.subr.bf16.mxu0 %v1929_v7  ;;  %1835 = vmatprep.subr.bf16.mxu1 %v1929_v7 }
  0x70   : > { %1761 = vmatpush3.bf16.msra.mxu0 %v1929_v7  ;;  %1843 = vmatpush3.bf16.msra.mxu1 %v1929_v7 }
  0x71   : > { %1762 = vmatprep.subr.bf16.mxu0 %v1930_v8  ;;  %1836 = vmatprep.subr.bf16.mxu1 %v1930_v8 }
  0x74   : > { %1763 = vmatpush3.bf16.msra.mxu0 %v1930_v8  ;;  %1844 = vmatpush3.bf16.msra.mxu1 %v1930_v8 }
  0x75   : > { %1764 = vmatprep.subr.bf16.mxu0 %v1931_v9  ;;  %1837 = vmatprep.subr.bf16.mxu1 %v1931_v9 }
  0x78   : > { %1765 = vmatpush3.bf16.msra.mxu0 %v1931_v9  ;;  %1845 = vmatpush3.bf16.msra.mxu1 %v1931_v9 }
  0x7b   : > { %1767 = vmatmul.mubr.bf16.vlgmr.msra.gmra.mrb[0].mxu0 %v1934_v10  ;;  %1799 = vmatmul.mubr.bf16.vlgmr.msra.gmra.mrb[0].mxu1 %v1935_v11 }
  0x7c   : > { %1770 = vmatprep.mubr.bf16.mxu0 %v1936_v12  ;;  %1802 = vmatprep.mubr.bf16.mxu1 %v1937_v13 }
  0x83   : > { %1771 = vmatmul.mubr.bf16.gmra.mrb[4].mxu0 %v1938_v14  ;;  %1803 = vmatmul.mubr.bf16.gmra.mrb[4].mxu1 %v1939_v15 }
  0x84   : > { %1774 = vmatprep.mubr.bf16.mxu0 %v1940_v16  ;;  %1806 = vmatprep.mubr.bf16.mxu1 %v1941_v17 }
  0x8b   : > { %1775 = vmatmul.mubr.bf16.gmra.mrb[8].mxu0 %v1942_v18  ;;  %1807 = vmatmul.mubr.bf16.gmra.mrb[8].mxu1 %v1943_v19 }
  0x8c   : > { %1778 = vmatprep.mubr.bf16.mxu0 %v1944_v20  ;;  %1810 = vmatprep.mubr.bf16.mxu1 %v1945_v21 }
  0x93   : > { %1779 = vmatmul.mubr.bf16.gmra.mrb[12].mxu0 %v1946_v22  ;;  %1811 = vmatmul.mubr.bf16.gmra.mrb[12].mxu1 %v1947_v23 }
  0x94   : > { %1782 = vmatprep.mubr.bf16.mxu0 %v1948_v24  ;;  %1814 = vmatprep.mubr.bf16.mxu1 %v1949_v25 }
  0x9b   : > { %1783 = vmatmul.mubr.bf16.gmra.mrb[16].mxu0 %v1950_v26  ;;  %1815 = vmatmul.mubr.bf16.gmra.mrb[16].mxu1 %v1951_v27 }
  0x9c   : > { %1786 = vmatprep.mubr.bf16.mxu0 %v1952_v28  ;;  %1818 = vmatprep.mubr.bf16.mxu1 %v1953_v29 }
  0xa3   : > { %1787 = vmatmul.mubr.bf16.gmra.mrb[20].mxu0 %v1954_v30  ;;  %1819 = vmatmul.mubr.bf16.gmra.mrb[20].mxu1 %v1955_v31 }
  0xa4   : > { %1790 = vmatprep.mubr.bf16.mxu0 %v1956_v32  ;;  %1822 = vmatprep.mubr.bf16.mxu1 %v1957_v33 }
  0xab   : > { %1791 = vmatmul.mubr.bf16.gmra.mrb[24].mxu0 %v1958_v34  ;;  %1823 = vmatmul.mubr.bf16.gmra.mrb[24].mxu1 %v1959_v35 }
  0xac   : > { %1794 = vmatprep.mubr.bf16.mxu0 %v1960_v36  ;;  %1826 = vmatprep.mubr.bf16.mxu1 %v1961_v37 }
  0xb3   : > { %1795 = vmatmul.mubr.bf16.gmra.mrb[28].mxu0 %v1962_v38  ;;  %1827 = vmatmul.mubr.bf16.gmra.mrb[28].mxu1 %v1963_v39 }
 0x14e   : > { %v1768_v40 = vpop.f32.mrb[0].mxu0  ;;  %v1800_v42 = vpop.f32.mrb[0].mxu1 }
 0x14f   : > { %v743_v43 = vpop.f32.mrb[1].mxu0  ;;  %v871_v44 = vpop.f32.mrb[1].mxu1  ;;  %v1202_v47 = vadd.f32 %v1768_v40, %v2343_v41  ;;  %v1234_v48 = vadd.f32 %v1800_v42, %v2343_v41 }
 0x150   : > { %v1769_v45 = vpop.f32.mrb[2].mxu0  ;;  %v1801_v46 = vpop.f32.mrb[2].mxu1  ;;  %v1200_v51 = vadd.f32 %v2343_v41, %v743_v43  ;;  %v1232_v52 = vadd.f32 %v2343_v41, %v871_v44 }
 0x151   : > { %v746_v49 = vpop.f32.mrb[3].mxu0  ;;  %v874_v50 = vpop.f32.mrb[3].mxu1  ;;  %vm1266_vm0 = vcmp.ge.f32.partialorder %v1202_v47, 0.0  ;;  %v1330_v53 = vmul.f32 0.1, %v1202_v47  ;;  %vm1298_vm1 = vcmp.ge.f32.partialorder %v1234_v48, 0.0  ;;  %v1203_v59 = vadd.f32 %v1769_v45, %v2343_v41 }
 0x152   : > { %v1362_v54 = vmul.f32 0.1, %v1234_v48  ;;  %vm1264_vm2 = vcmp.ge.f32.partialorder %v1200_v51, 0.0  ;;  %v1328_v55 = vmul.f32 0.1, %v1200_v51  ;;  %vm1296_vm3 = vcmp.ge.f32.partialorder %v1232_v52, 0.0 }
 0x153   : > { %v1360_v56 = vmul.f32 0.1, %v1232_v52  ;;  %v1394_v57 = vsel %vm1266_vm0, %v1202_v47, %v1330_v53  ;;  %v1235_v60 = vadd.f32 %v1801_v46, %v2343_v41  ;;  %v1201_v63 = vadd.f32 %v2343_v41, %v746_v49 }
 0x154   : > { %v1426_v58 = vsel %vm1298_vm1, %v1234_v48, %v1362_v54  ;;  %1458 = vst [vmem:[%s2352_s10 + $0x10] sm:$0xff] %v1394_v57  ;;  %v1392_v61 = vsel %vm1264_vm2, %v1200_v51, %v1328_v55  ;;  %v1233_v0 = vadd.f32 %v2343_v41, %v874_v50  ;;  %vm1267_vm4 = vcmp.ge.f32.partialorder %v1203_v59, 0.0 }
 0x155   : > { %1490 = vst [vmem:[%s2352_s10 + $0x110] sm:$0xff] %v1426_v58  ;;  %v1424_v62 = vsel %vm1296_vm3, %v1232_v52, %v1360_v56  ;;  %1456 = vst [vmem:[%s2352_s10] sm:$0xff] %v1392_v61  ;;  %v1331_v3 = vmul.f32 0.1, %v1203_v59  ;;  %vm1299_vm5 = vcmp.ge.f32.partialorder %v1235_v60, 0.0  ;;  %v1363_v4 = vmul.f32 0.1, %v1235_v60 }
 0x156   : > { %v1772_v1 = vpop.f32.mrb[4].mxu0  ;;  %v1804_v2 = vpop.f32.mrb[4].mxu1  ;;  %1488 = vst [vmem:[%s2352_s10 + $0x100] sm:$0xff] %v1424_v62  ;;  %vm1265_vm6 = vcmp.ge.f32.partialorder %v1201_v63, 0.0  ;;  %v1329_v5 = vmul.f32 0.1, %v1201_v63 }
 0x157   : > { %vm1297_vm7 = vcmp.ge.f32.partialorder %v1233_v0, 0.0  ;;  %v1361_v6 = vmul.f32 0.1, %v1233_v0  ;;  %v1395_v7 = vsel %vm1267_vm4, %v1203_v59, %v1331_v3  ;;  %v1427_v8 = vsel %vm1299_vm5, %v1235_v60, %v1363_v4  ;;  %v759_v9 = vpop.f32.mrb[5].mxu0  ;;  %v887_v10 = vpop.f32.mrb[5].mxu1 }
 0x158   : > { %1459 = vst [vmem:[%s2352_s10 + $0x18] sm:$0xff] %v1395_v7  ;;  %1491 = vst [vmem:[%s2352_s10 + $0x118] sm:$0xff] %v1427_v8  ;;  %v1393_v11 = vsel %vm1265_vm6, %v1201_v63, %v1329_v5  ;;  %v1773_v13 = vpop.f32.mrb[6].mxu0  ;;  %v1805_v14 = vpop.f32.mrb[6].mxu1  ;;  %v1206_v15 = vadd.f32 %v1772_v1, %v2343_v41  ;;  %v1238_v16 = vadd.f32 %v1804_v2, %v2343_v41 }
 0x159   : > { %v1425_v12 = vsel %vm1297_vm7, %v1233_v0, %v1361_v6  ;;  %1457 = vst [vmem:[%s2352_s10 + $0x8] sm:$0xff] %v1393_v11  ;;  %v762_v17 = vpop.f32.mrb[7].mxu0  ;;  %v890_v18 = vpop.f32.mrb[7].mxu1  ;;  %v1204_v19 = vadd.f32 %v2343_v41, %v759_v9  ;;  %v1236_v20 = vadd.f32 %v2343_v41, %v887_v10  ;;  %v1207_v27 = vadd.f32 %v1773_v13, %v2343_v41 }
 0x15a   : > { %1489 = vst [vmem:[%s2352_s10 + $0x108] sm:$0xff] %v1425_v12  ;;  %vm1270_vm8 = vcmp.ge.f32.partialorder %v1206_v15, 0.0  ;;  %v1334_v21 = vmul.f32 0.1, %v1206_v15  ;;  %vm1302_vm9 = vcmp.ge.f32.partialorder %v1238_v16, 0.0  ;;  %v1239_v28 = vadd.f32 %v1805_v14, %v2343_v41 }
 0x15b   : > { %v1366_v22 = vmul.f32 0.1, %v1238_v16  ;;  %vm1268_vm10 = vcmp.ge.f32.partialorder %v1204_v19, 0.0  ;;  %v1332_v23 = vmul.f32 0.1, %v1204_v19  ;;  %vm1300_vm11 = vcmp.ge.f32.partialorder %v1236_v20, 0.0 }
 0x15c   : > { %v1364_v24 = vmul.f32 0.1, %v1236_v20  ;;  %v1398_v25 = vsel %vm1270_vm8, %v1206_v15, %v1334_v21  ;;  %v1205_v33 = vadd.f32 %v2343_v41, %v762_v17  ;;  %v1237_v34 = vadd.f32 %v2343_v41, %v890_v18 }
 0x15d   : > { %v1430_v26 = vsel %vm1302_vm9, %v1238_v16, %v1366_v22  ;;  %1462 = vst [vmem:[%s2352_s10 + $0x30] sm:$0xff] %v1398_v25  ;;  %v1396_v31 = vsel %vm1268_vm10, %v1204_v19, %v1332_v23  ;;  %vm1271_vm12 = vcmp.ge.f32.partialorder %v1207_v27, 0.0  ;;  %v1335_v37 = vmul.f32 0.1, %v1207_v27 }
 0x15e   : > { %v1776_v29 = vpop.f32.mrb[8].mxu0  ;;  %v1808_v30 = vpop.f32.mrb[8].mxu1  ;;  %1494 = vst [vmem:[%s2352_s10 + $0x130] sm:$0xff] %v1430_v26  ;;  %v1428_v32 = vsel %vm1300_vm11, %v1236_v20, %v1364_v24  ;;  %1460 = vst [vmem:[%s2352_s10 + $0x20] sm:$0xff] %v1396_v31  ;;  %vm1303_vm13 = vcmp.ge.f32.partialorder %v1239_v28, 0.0  ;;  %vm1269_vm14 = vcmp.ge.f32.partialorder %v1205_v33, 0.0 }
 0x15f   : > { %v775_v35 = vpop.f32.mrb[9].mxu0  ;;  %v903_v36 = vpop.f32.mrb[9].mxu1  ;;  %1492 = vst [vmem:[%s2352_s10 + $0x120] sm:$0xff] %v1428_v32  ;;  %v1367_v38 = vmul.f32 0.1, %v1239_v28  ;;  %vm1301_vm15 = vcmp.ge.f32.partialorder %v1237_v34, 0.0  ;;  %v1399_v42 = vsel %vm1271_vm12, %v1207_v27, %v1335_v37  ;;  %v1210_v50 = vadd.f32 %v1776_v29, %v2343_v41 }
 0x160   : > { %v1333_v39 = vmul.f32 0.1, %v1205_v33  ;;  %v1365_v40 = vmul.f32 0.1, %v1237_v34  ;;  %v1777_v44 = vpop.f32.mrb[10].mxu0  ;;  %v1809_v45 = vpop.f32.mrb[10].mxu1  ;;  %v1242_v51 = vadd.f32 %v1808_v30, %v2343_v41  ;;  %v1208_v52 = vadd.f32 %v2343_v41, %v775_v35 }
 0x161   : > { %v1431_v43 = vsel %vm1303_vm13, %v1239_v28, %v1367_v38  ;;  %1463 = vst [vmem:[%s2352_s10 + $0x38] sm:$0xff] %v1399_v42  ;;  %v778_v48 = vpop.f32.mrb[11].mxu0  ;;  %v906_v49 = vpop.f32.mrb[11].mxu1  ;;  %v1240_v53 = vadd.f32 %v2343_v41, %v903_v36  ;;  %vm1274_vm0 = vcmp.ge.f32.partialorder %v1210_v50, 0.0  ;;  %v1338_v56 = vmul.f32 0.1, %v1210_v50 }
 0x162   : > { %1495 = vst [vmem:[%s2352_s10 + $0x138] sm:$0xff] %v1431_v43  ;;  %v1397_v46 = vsel %vm1269_vm14, %v1205_v33, %v1333_v39  ;;  %v1429_v47 = vsel %vm1301_vm15, %v1237_v34, %v1365_v40  ;;  %vm1306_vm1 = vcmp.ge.f32.partialorder %v1242_v51, 0.0  ;;  %v1370_v57 = vmul.f32 0.1, %v1242_v51 }
 0x163   : > { %1461 = vst [vmem:[%s2352_s10 + $0x28] sm:$0xff] %v1397_v46  ;;  %1493 = vst [vmem:[%s2352_s10 + $0x128] sm:$0xff] %v1429_v47  ;;  %vm1272_vm2 = vcmp.ge.f32.partialorder %v1208_v52, 0.0  ;;  %v1336_v58 = vmul.f32 0.1, %v1208_v52  ;;  %vm1304_vm3 = vcmp.ge.f32.partialorder %v1240_v53, 0.0  ;;  %v1402_v60 = vsel %vm1274_vm0, %v1210_v50, %v1338_v56 }
 0x164   : > { %v1368_v59 = vmul.f32 0.1, %v1240_v53  ;;  %v1434_v61 = vsel %vm1306_vm1, %v1242_v51, %v1370_v57  ;;  %v1211_v62 = vadd.f32 %v1777_v44, %v2343_v41  ;;  %v1243_v63 = vadd.f32 %v1809_v45, %v2343_v41  ;;  %1466 = vst [vmem:[%s2352_s10 + $0x50] sm:$0xff] %v1402_v60 }
 0x165   : > { %1498 = vst [vmem:[%s2352_s10 + $0x150] sm:$0xff] %v1434_v61  ;;  %v1400_v2 = vsel %vm1272_vm2, %v1208_v52, %v1336_v58  ;;  %v1209_v4 = vadd.f32 %v2343_v41, %v778_v48  ;;  %v1241_v5 = vadd.f32 %v2343_v41, %v906_v49 }
 0x166   : > { %v1780_v54 = vpop.f32.mrb[12].mxu0  ;;  %v1812_v55 = vpop.f32.mrb[12].mxu1  ;;  %v1432_v3 = vsel %vm1304_vm3, %v1240_v53, %v1368_v59  ;;  %1464 = vst [vmem:[%s2352_s10 + $0x40] sm:$0xff] %v1400_v2  ;;  %vm1275_vm4 = vcmp.ge.f32.partialorder %v1211_v62, 0.0  ;;  %v1339_v8 = vmul.f32 0.1, %v1211_v62 }
 0x167   : > { %v791_v0 = vpop.f32.mrb[13].mxu0  ;;  %v919_v1 = vpop.f32.mrb[13].mxu1  ;;  %1496 = vst [vmem:[%s2352_s10 + $0x140] sm:$0xff] %v1432_v3  ;;  %vm1307_vm5 = vcmp.ge.f32.partialorder %v1243_v63, 0.0  ;;  %v1371_v9 = vmul.f32 0.1, %v1243_v63  ;;  %v1214_v20 = vadd.f32 %v1780_v54, %v2343_v41  ;;  %v1246_v21 = vadd.f32 %v1812_v55, %v2343_v41 }
 0x168   : > { %v1781_v6 = vpop.f32.mrb[14].mxu0  ;;  %v1813_v7 = vpop.f32.mrb[14].mxu1  ;;  %vm1273_vm6 = vcmp.ge.f32.partialorder %v1209_v4, 0.0  ;;  %v1337_v10 = vmul.f32 0.1, %v1209_v4  ;;  %vm1305_vm7 = vcmp.ge.f32.partialorder %v1241_v5, 0.0  ;;  %v1403_v12 = vsel %vm1275_vm4, %v1211_v62, %v1339_v8 }
 0x169   : > { %v1369_v11 = vmul.f32 0.1, %v1241_v5  ;;  %v1435_v13 = vsel %vm1307_vm5, %v1243_v63, %v1371_v9  ;;  %v794_v14 = vpop.f32.mrb[15].mxu0  ;;  %v922_v15 = vpop.f32.mrb[15].mxu1  ;;  %1467 = vst [vmem:[%s2352_s10 + $0x58] sm:$0xff] %v1403_v12  ;;  %v1212_v24 = vadd.f32 %v2343_v41, %v791_v0  ;;  %v1244_v25 = vadd.f32 %v2343_v41, %v919_v1 }
 0x16a   : > { %1499 = vst [vmem:[%s2352_s10 + $0x158] sm:$0xff] %v1435_v13  ;;  %v1401_v16 = vsel %vm1273_vm6, %v1209_v4, %v1337_v10  ;;  %vm1278_vm8 = vcmp.ge.f32.partialorder %v1214_v20, 0.0  ;;  %v1342_v28 = vmul.f32 0.1, %v1214_v20  ;;  %vm1310_vm9 = vcmp.ge.f32.partialorder %v1246_v21, 0.0 }
 0x16b   : > { %v1433_v17 = vsel %vm1305_vm7, %v1241_v5, %v1369_v11  ;;  %1465 = vst [vmem:[%s2352_s10 + $0x48] sm:$0xff] %v1401_v16  ;;  %v1374_v29 = vmul.f32 0.1, %v1246_v21  ;;  %vm1276_vm10 = vcmp.ge.f32.partialorder %v1212_v24, 0.0  ;;  %v1340_v30 = vmul.f32 0.1, %v1212_v24 }
 0x16c   : > { %1497 = vst [vmem:[%s2352_s10 + $0x148] sm:$0xff] %v1433_v17  ;;  %vm1308_vm11 = vcmp.ge.f32.partialorder %v1244_v25, 0.0  ;;  %v1372_v31 = vmul.f32 0.1, %v1244_v25  ;;  %v1406_v32 = vsel %vm1278_vm8, %v1214_v20, %v1342_v28  ;;  %v1215_v34 = vadd.f32 %v1781_v6, %v2343_v41 }
 0x16d   : > { %v1438_v33 = vsel %vm1310_vm9, %v1246_v21, %v1374_v29  ;;  %v1247_v35 = vadd.f32 %v1813_v7, %v2343_v41  ;;  %1470 = vst [vmem:[%s2352_s10 + $0x70] sm:$0xff] %v1406_v32  ;;  %v1404_v38 = vsel %vm1276_vm10, %v1212_v24, %v1340_v30  ;;  %v1213_v40 = vadd.f32 %v2343_v41, %v794_v14 }
 0x16e   : > { %v1784_v18 = vpop.f32.mrb[16].mxu0  ;;  %v1816_v19 = vpop.f32.mrb[16].mxu1  ;;  %1502 = vst [vmem:[%s2352_s10 + $0x170] sm:$0xff] %v1438_v33  ;;  %v1436_v39 = vsel %vm1308_vm11, %v1244_v25, %v1372_v31  ;;  %v1245_v42 = vadd.f32 %v2343_v41, %v922_v15  ;;  %1468 = vst [vmem:[%s2352_s10 + $0x60] sm:$0xff] %v1404_v38  ;;  %vm1279_vm12 = vcmp.ge.f32.partialorder %v1215_v34, 0.0 }
 0x16f   : > { %v807_v22 = vpop.f32.mrb[17].mxu0  ;;  %v935_v23 = vpop.f32.mrb[17].mxu1  ;;  %1500 = vst [vmem:[%s2352_s10 + $0x160] sm:$0xff] %v1436_v39  ;;  %v1343_v43 = vmul.f32 0.1, %v1215_v34  ;;  %vm1311_vm13 = vcmp.ge.f32.partialorder %v1247_v35, 0.0  ;;  %v1218_v55 = vadd.f32 %v1784_v18, %v2343_v41  ;;  %v1250_v56 = vadd.f32 %v1816_v19, %v2343_v41 }
 0x170   : > { %v2400_v26 = vpop.f32.mrb[18].mxu0  ;;  %v1817_v27 = vpop.f32.mrb[18].mxu1  ;;  %v1375_v44 = vmul.f32 0.1, %v1247_v35  ;;  %vm1277_vm14 = vcmp.ge.f32.partialorder %v1213_v40, 0.0  ;;  %vm1309_vm15 = vcmp.ge.f32.partialorder %v1245_v42, 0.0  ;;  %v1216_v59 = vadd.f32 %v2343_v41, %v807_v22 }
 0x171   : > { %v810_v36 = vpop.f32.mrb[19].mxu0  ;;  %v938_v37 = vpop.f32.mrb[19].mxu1  ;;  %v1341_v45 = vmul.f32 0.1, %v1213_v40  ;;  %v1373_v46 = vmul.f32 0.1, %v1245_v42  ;;  %v1407_v47 = vsel %vm1279_vm12, %v1215_v34, %v1343_v43  ;;  %v1248_v60 = vadd.f32 %v2343_v41, %v935_v23 }
 0x172   : > { %v1439_v48 = vsel %vm1311_vm13, %v1247_v35, %v1375_v44  ;;  %1471 = vst [vmem:[%s2352_s10 + $0x78] sm:$0xff] %v1407_v47  ;;  %vm1282_vm0 = vcmp.ge.f32.partialorder %v1218_v55, 0.0  ;;  %v1346_v63 = vmul.f32 0.1, %v1218_v55  ;;  %vm1314_vm1 = vcmp.ge.f32.partialorder %v1250_v56, 0.0 }
 0x173   : > { %1503 = vst [vmem:[%s2352_s10 + $0x178] sm:$0xff] %v1439_v48  ;;  %v1405_v51 = vsel %vm1277_vm14, %v1213_v40, %v1341_v45  ;;  %v1437_v52 = vsel %vm1309_vm15, %v1245_v42, %v1373_v46  ;;  %v1378_v0 = vmul.f32 0.1, %v1250_v56  ;;  %vm1280_vm2 = vcmp.ge.f32.partialorder %v1216_v59, 0.0 }
 0x174   : > { %1469 = vst [vmem:[%s2352_s10 + $0x68] sm:$0xff] %v1405_v51  ;;  %1501 = vst [vmem:[%s2352_s10 + $0x168] sm:$0xff] %v1437_v52  ;;  %v1344_v1 = vmul.f32 0.1, %v1216_v59  ;;  %vm1312_vm3 = vcmp.ge.f32.partialorder %v1248_v60, 0.0  ;;  %v1410_v3 = vsel %vm1282_vm0, %v1218_v55, %v1346_v63  ;;  %v1219_v5 = vadd.f32 %v2400_v26, %v2343_v41 }
 0x175   : > { %v1376_v2 = vmul.f32 0.1, %v1248_v60  ;;  %v1442_v4 = vsel %vm1314_vm1, %v1250_v56, %v1378_v0  ;;  %v1251_v6 = vadd.f32 %v1817_v27, %v2343_v41  ;;  %1474 = vst [vmem:[%s2352_s10 + $0x90] sm:$0xff] %v1410_v3  ;;  %v1217_v9 = vadd.f32 %v2343_v41, %v810_v36 }
 0x176   : > { %v1788_v49 = vpop.f32.mrb[20].mxu0  ;;  %v1820_v50 = vpop.f32.mrb[20].mxu1  ;;  %1506 = vst [vmem:[%s2352_s10 + $0x190] sm:$0xff] %v1442_v4  ;;  %v1408_v7 = vsel %vm1280_vm2, %v1216_v59, %v1344_v1  ;;  %v1249_v10 = vadd.f32 %v2343_v41, %v938_v37  ;;  %vm1283_vm4 = vcmp.ge.f32.partialorder %v1219_v5, 0.0  ;;  %v1347_v13 = vmul.f32 0.1, %v1219_v5 }
 0x177   : > { %v823_v53 = vpop.f32.mrb[21].mxu0  ;;  %v951_v54 = vpop.f32.mrb[21].mxu1  ;;  %v1440_v8 = vsel %vm1312_vm3, %v1248_v60, %v1376_v2  ;;  %1472 = vst [vmem:[%s2352_s10 + $0x80] sm:$0xff] %v1408_v7  ;;  %vm1315_vm5 = vcmp.ge.f32.partialorder %v1251_v6, 0.0  ;;  %v1379_v14 = vmul.f32 0.1, %v1251_v6  ;;  %v1222_v25 = vadd.f32 %v1788_v49, %v2343_v41 }
 0x178   : > { %v2416_v57 = vpop.f32.mrb[22].mxu0  ;;  %v2418_v58 = vpop.f32.mrb[22].mxu1  ;;  %1504 = vst [vmem:[%s2352_s10 + $0x180] sm:$0xff] %v1440_v8  ;;  %vm1281_vm6 = vcmp.ge.f32.partialorder %v1217_v9, 0.0  ;;  %v1345_v15 = vmul.f32 0.1, %v1217_v9  ;;  %v1411_v17 = vsel %vm1283_vm4, %v1219_v5, %v1347_v13  ;;  %v1254_v26 = vadd.f32 %v1820_v50, %v2343_v41 }
 0x179   : > { %v2422_v61 = vpop.f32.mrb[23].mxu0  ;;  %v2424_v62 = vpop.f32.mrb[23].mxu1  ;;  %vm1313_vm7 = vcmp.ge.f32.partialorder %v1249_v10, 0.0  ;;  %v1377_v16 = vmul.f32 0.1, %v1249_v10  ;;  %v1443_v18 = vsel %vm1315_vm5, %v1251_v6, %v1379_v14  ;;  %1475 = vst [vmem:[%s2352_s10 + $0x98] sm:$0xff] %v1411_v17  ;;  %v1220_v29 = vadd.f32 %v2343_v41, %v823_v53 }
 0x17a   : > { %1507 = vst [vmem:[%s2352_s10 + $0x198] sm:$0xff] %v1443_v18  ;;  %v1409_v21 = vsel %vm1281_vm6, %v1217_v9, %v1345_v15  ;;  %v1252_v30 = vadd.f32 %v2343_v41, %v951_v54  ;;  %vm1286_vm8 = vcmp.ge.f32.partialorder %v1222_v25, 0.0  ;;  %v1350_v31 = vmul.f32 0.1, %v1222_v25 }
 0x17b   : > { %v1441_v22 = vsel %vm1313_vm7, %v1249_v10, %v1377_v16  ;;  %1473 = vst [vmem:[%s2352_s10 + $0x88] sm:$0xff] %v1409_v21  ;;  %vm1318_vm9 = vcmp.ge.f32.partialorder %v1254_v26, 0.0  ;;  %v1382_v32 = vmul.f32 0.1, %v1254_v26  ;;  %vm1284_vm10 = vcmp.ge.f32.partialorder %v1220_v29, 0.0 }
 0x17c   : > { %1505 = vst [vmem:[%s2352_s10 + $0x188] sm:$0xff] %v1441_v22  ;;  %v1348_v33 = vmul.f32 0.1, %v1220_v29  ;;  %vm1316_vm11 = vcmp.ge.f32.partialorder %v1252_v30, 0.0  ;;  %v1380_v34 = vmul.f32 0.1, %v1252_v30  ;;  %v1414_v35 = vsel %vm1286_vm8, %v1222_v25, %v1350_v31 }
 0x17d   : > { %v1446_v36 = vsel %vm1318_vm9, %v1254_v26, %v1382_v32  ;;  %v1223_v37 = vadd.f32 %v2416_v57, %v2343_v41  ;;  %v1255_v38 = vadd.f32 %v2418_v58, %v2343_v41  ;;  %1478 = vst [vmem:[%s2352_s10 + $0xb0] sm:$0xff] %v1414_v35  ;;  %v1221_v44 = vadd.f32 %v2343_v41, %v2422_v61 }
 0x17e   : > { %v2433_v11 = vpop.f32.mrb[24].mxu0  ;;  %v2435_v12 = vpop.f32.mrb[24].mxu1  ;;  %1510 = vst [vmem:[%s2352_s10 + $0x1b0] sm:$0xff] %v1446_v36  ;;  %v1412_v42 = vsel %vm1284_vm10, %v1220_v29, %v1348_v33  ;;  %v1444_v43 = vsel %vm1316_vm11, %v1252_v30, %v1380_v34  ;;  %v1253_v45 = vadd.f32 %v2343_v41, %v2424_v62 }
 0x17f   : > { %v839_v19 = vpop.f32.mrb[25].mxu0  ;;  %v967_v20 = vpop.f32.mrb[25].mxu1  ;;  %1476 = vst [vmem:[%s2352_s10 + $0xa0] sm:$0xff] %v1412_v42  ;;  %1508 = vst [vmem:[%s2352_s10 + $0x1a0] sm:$0xff] %v1444_v43  ;;  %vm1287_vm12 = vcmp.ge.f32.partialorder %v1223_v37, 0.0  ;;  %vm1319_vm13 = vcmp.ge.f32.partialorder %v1255_v38, 0.0  ;;  %v1226_v60 = vadd.f32 %v2433_v11, %v2343_v41  ;;  %v1258_v61 = vadd.f32 %v2435_v12, %v2343_v41 }
 0x180   : > { %v2441_v23 = vpop.f32.mrb[26].mxu0  ;;  %v2443_v24 = vpop.f32.mrb[26].mxu1  ;;  %v1351_v48 = vmul.f32 0.1, %v1223_v37  ;;  %v1383_v49 = vmul.f32 0.1, %v1255_v38  ;;  %v1224_v62 = vadd.f32 %v2343_v41, %v839_v19  ;;  %v1256_v63 = vadd.f32 %v2343_v41, %v967_v20 }
 0x181   : > { %v2449_v27 = vpop.f32.mrb[27].mxu0  ;;  %v2451_v28 = vpop.f32.mrb[27].mxu1  ;;  %vm1285_vm14 = vcmp.ge.f32.partialorder %v1221_v44, 0.0  ;;  %v1349_v50 = vmul.f32 0.1, %v1221_v44  ;;  %vm1317_vm15 = vcmp.ge.f32.partialorder %v1253_v45, 0.0  ;;  %v1227_v6 = vadd.f32 %v2441_v23, %v2343_v41 }
 0x182   : > { %v1381_v51 = vmul.f32 0.1, %v1253_v45  ;;  %v1415_v52 = vsel %vm1287_vm12, %v1223_v37, %v1351_v48  ;;  %v1447_v53 = vsel %vm1319_vm13, %v1255_v38, %v1383_v49  ;;  %vm1290_vm0 = vcmp.ge.f32.partialorder %v1226_v60, 0.0 }
 0x183   : > { %1479 = vst [vmem:[%s2352_s10 + $0xb8] sm:$0xff] %v1415_v52  ;;  %1511 = vst [vmem:[%s2352_s10 + $0x1b8] sm:$0xff] %v1447_v53  ;;  %v1413_v56 = vsel %vm1285_vm14, %v1221_v44, %v1349_v50  ;;  %v1354_v0 = vmul.f32 0.1, %v1226_v60  ;;  %vm1322_vm1 = vcmp.ge.f32.partialorder %v1258_v61, 0.0  ;;  %vm1288_vm2 = vcmp.ge.f32.partialorder %v1224_v62, 0.0 }
 0x184   : > { %v1445_v57 = vsel %vm1317_vm15, %v1253_v45, %v1381_v51  ;;  %1477 = vst [vmem:[%s2352_s10 + $0xa8] sm:$0xff] %v1413_v56  ;;  %v1386_v1 = vmul.f32 0.1, %v1258_v61  ;;  %v1352_v2 = vmul.f32 0.1, %v1224_v62  ;;  %vm1320_vm3 = vcmp.ge.f32.partialorder %v1256_v63, 0.0 }
 0x185   : > { %1509 = vst [vmem:[%s2352_s10 + $0x1a8] sm:$0xff] %v1445_v57  ;;  %v1384_v3 = vmul.f32 0.1, %v1256_v63  ;;  %v1418_v4 = vsel %vm1290_vm0, %v1226_v60, %v1354_v0  ;;  %v1259_v7 = vadd.f32 %v2443_v24, %v2343_v41  ;;  %v1225_v10 = vadd.f32 %v2343_v41, %v2449_v27 }
 0x186   : > { %v2459_v39 = vpop.f32.mrb[28].mxu0  ;;  %v2461_v40 = vpop.f32.mrb[28].mxu1  ;;  %v1450_v5 = vsel %vm1322_vm1, %v1258_v61, %v1386_v1  ;;  %1482 = vst [vmem:[%s2352_s10 + $0xd0] sm:$0xff] %v1418_v4  ;;  %v1416_v8 = vsel %vm1288_vm2, %v1224_v62, %v1352_v2  ;;  %v1257_v11 = vadd.f32 %v2343_v41, %v2451_v28  ;;  %vm1291_vm4 = vcmp.ge.f32.partialorder %v1227_v6, 0.0 }
 0x187   : > { %v2469_v46 = vpop.f32.mrb[29].mxu0  ;;  %v2471_v47 = vpop.f32.mrb[29].mxu1  ;;  %1514 = vst [vmem:[%s2352_s10 + $0x1d0] sm:$0xff] %v1450_v5  ;;  %v1448_v9 = vsel %vm1320_vm3, %v1256_v63, %v1384_v3  ;;  %1480 = vst [vmem:[%s2352_s10 + $0xc0] sm:$0xff] %v1416_v8  ;;  %v1355_v12 = vmul.f32 0.1, %v1227_v6  ;;  %v1230_v20 = vadd.f32 %v2459_v39, %v2343_v41  ;;  %v1262_v21 = vadd.f32 %v2461_v40, %v2343_v41 }
 0x188   : > { %v2475_v54 = vpop.f32.mrb[30].mxu0  ;;  %v2477_v55 = vpop.f32.mrb[30].mxu1  ;;  %1512 = vst [vmem:[%s2352_s10 + $0x1c0] sm:$0xff] %v1448_v9  ;;  %vm1323_vm5 = vcmp.ge.f32.partialorder %v1259_v7, 0.0  ;;  %v1387_v13 = vmul.f32 0.1, %v1259_v7  ;;  %v1228_v22 = vadd.f32 %v2343_v41, %v2469_v46  ;;  %v1260_v23 = vadd.f32 %v2343_v41, %v2471_v47 }
 0x189   : > { %v2481_v58 = vpop.f32.mrb[31].mxu0  ;;  %v2483_v59 = vpop.f32.mrb[31].mxu1  ;;  %vm1289_vm6 = vcmp.ge.f32.partialorder %v1225_v10, 0.0  ;;  %v1353_v14 = vmul.f32 0.1, %v1225_v10  ;;  %vm1321_vm7 = vcmp.ge.f32.partialorder %v1257_v11, 0.0  ;;  %v1419_v16 = vsel %vm1291_vm4, %v1227_v6, %v1355_v12 }
 0x18a   : > { %v1385_v15 = vmul.f32 0.1, %v1257_v11  ;;  %v1451_v17 = vsel %vm1323_vm5, %v1259_v7, %v1387_v13  ;;  %1483 = vst [vmem:[%s2352_s10 + $0xd8] sm:$0xff] %v1419_v16  ;;  %vm1294_vm8 = vcmp.ge.f32.partialorder %v1230_v20, 0.0  ;;  %v1358_v24 = vmul.f32 0.1, %v1230_v20 }
 0x18b   : > { %1515 = vst [vmem:[%s2352_s10 + $0x1d8] sm:$0xff] %v1451_v17  ;;  %v1417_v18 = vsel %vm1289_vm6, %v1225_v10, %v1353_v14  ;;  %vm1326_vm9 = vcmp.ge.f32.partialorder %v1262_v21, 0.0  ;;  %v1390_v25 = vmul.f32 0.1, %v1262_v21  ;;  %vm1292_vm10 = vcmp.ge.f32.partialorder %v1228_v22, 0.0 }
 0x18c   : > { %v1449_v19 = vsel %vm1321_vm7, %v1257_v11, %v1385_v15  ;;  %1481 = vst [vmem:[%s2352_s10 + $0xc8] sm:$0xff] %v1417_v18  ;;  %v1356_v26 = vmul.f32 0.1, %v1228_v22  ;;  %vm1324_vm11 = vcmp.ge.f32.partialorder %v1260_v23, 0.0  ;;  %v1388_v27 = vmul.f32 0.1, %v1260_v23 }
 0x18d   : > { %1513 = vst [vmem:[%s2352_s10 + $0x1c8] sm:$0xff] %v1449_v19  ;;  %v1422_v28 = vsel %vm1294_vm8, %v1230_v20, %v1358_v24  ;;  %v1454_v29 = vsel %vm1326_vm9, %v1262_v21, %v1390_v25  ;;  %v1231_v30 = vadd.f32 %v2475_v54, %v2343_v41  ;;  %v1263_v31 = vadd.f32 %v2477_v55, %v2343_v41 }
 0x18e   : > { %1486 = vst [vmem:[%s2352_s10 + $0xf0] sm:$0xff] %v1422_v28  ;;  %1518 = vst [vmem:[%s2352_s10 + $0x1f0] sm:$0xff] %v1454_v29  ;;  %v1420_v32 = vsel %vm1292_vm10, %v1228_v22, %v1356_v26  ;;  %v1452_v33 = vsel %vm1324_vm11, %v1260_v23, %v1388_v27  ;;  %v1229_v34 = vadd.f32 %v2343_v41, %v2481_v58 }
 0x18f   : > { %v1261_v35 = vadd.f32 %v2343_v41, %v2483_v59  ;;  %1484 = vst [vmem:[%s2352_s10 + $0xe0] sm:$0xff] %v1420_v32  ;;  %1516 = vst [vmem:[%s2352_s10 + $0x1e0] sm:$0xff] %v1452_v33  ;;  %vm1295_vm12 = vcmp.ge.f32.partialorder %v1231_v30, 0.0  ;;  %v1359_v36 = vmul.f32 0.1, %v1231_v30  ;;  %vm1327_vm13 = vcmp.ge.f32.partialorder %v1263_v31, 0.0 }
 0x190   : > { %v1391_v37 = vmul.f32 0.1, %v1263_v31  ;;  %vm1293_vm14 = vcmp.ge.f32.partialorder %v1229_v34, 0.0  ;;  %v1357_v38 = vmul.f32 0.1, %v1229_v34 }
 0x191   : > { %vm1325_vm15 = vcmp.ge.f32.partialorder %v1261_v35, 0.0  ;;  %v1389_v39 = vmul.f32 0.1, %v1261_v35  ;;  %v1423_v41 = vsel %vm1295_vm12, %v1231_v30, %v1359_v36 }
 0x192   : > { %v1455_v40 = vsel %vm1327_vm13, %v1263_v31, %v1391_v37  ;;  %1487 = vst [vmem:[%s2352_s10 + $0xf8] sm:$0xff] %v1423_v41  ;;  %v1421_v42 = vsel %vm1293_vm14, %v1229_v34, %v1357_v38 }
 0x193   : > { %1519 = vst [vmem:[%s2352_s10 + $0x1f8] sm:$0xff] %v1455_v40  ;;  %v1453_v43 = vsel %vm1325_vm15, %v1261_v35, %v1389_v39  ;;  %1485 = vst [vmem:[%s2352_s10 + $0xe8] sm:$0xff] %v1421_v42 }
 0x194   : > { %1517 = vst [vmem:[%s2352_s10 + $0x1e8] sm:$0xff] %v1453_v43 }
 0x195   : > { %2035 = shalt.err (!%p2032_p5)
}
 0x196   : > { %s2036_s29 = scalar_lea.hbm %s2534_s19, 8192  ;;  %s2040_s20 = scalar_lea.hbm %s2591_s3, 32768 }
 0x197   : > { %p2037_p9 = scmp.ne.s32.totalorder %s2534_s19, %s2036_s29  ;;  %p2041_p3 = scmp.lt.u32.totalorder %s2534_s19, %s2591_s3 }
 0x198   : > { %p2042_p7 = scmp.lt.u32.totalorder %s2040_s20, %s2036_s29  ;;  %p2044_p4 = scmp.lt.u32.totalorder %s2036_s29, %s2534_s19 }
 0x199   : > { %p2038_p1 = pnand %p2037_p9, %p2235_p11 }
 0x19a   : > { %p2043_p13 = por %p2042_p7, %p2041_p3 }
 0x19b   : > { %p2039_p2 = pneg %p2038_p1 }
 0x19c   : > { %p2045_p6 = por %p2044_p4, %p2043_p13 }
 0x19e   : > { %p2046_p8 = pnand %p2045_p6, %p2039_p2 }
 0x1a0   : > { %2049 = shalt.err (!%p2046_p8)
}
 0x1a1   : > { %s2115_s10 = smov 128   ;;  %s2116_s11 = smov 8  }
 0x1a2   : > { %1852 = dma.vmem_to_hbm [thread:$0]  (%p2235_p11), %s2536_s9, 8192, %s2534_s19, %s1521_s25, %s2115_s10, %s2115_s10, %s2116_s11  }
 0x1a3 PF: > { %p1869_p12 = scmp.ge.s32.totalorder %s2108_s17, 2  ;;  %s1550_s15 = sand.u32 1, %s2088_s12  }
 0x1a4   : > { %p2609_p10 = scmp.ne.s32.totalorder %s2599_s23, 0  ;;  %s1551_s18 = scalar_lea.sflag [#allocation4], %s1550_s15 }
 0x1a6   : > { %p1863_p0 = pnand %p1869_p12, %p2609_p10 }
 0x1a8   : > { %2083 = dma.done.wait (!%p1863_p0), %s1551_s18, 8192  }
 0x1a9   : > { %2085 = vsyncadd (!%p1863_p0), %s1551_s18, 4294959104  ;;  %s20_s17 = sadd.s32 1, %s2108_s17   ;;  %s2610_s12 = smov %s2092_s13 }
 0x1aa   : > { %p17_p5 = scmp.ge.s32.totalorder %s20_s17, 6   ;;  %s2611_s13 = smov %s2096_s14 }
 0x1ab   : > { %s2612_s14 = smov %s2244_s5  ;;  %s2613_s15 = smov %s2104_s16 }
 0x1ac   : > { %s2614_s16 = smov %s2616_s28  ;;  %19 = sbr.rel (!%p17_p5) target bundleno = 7 (0x7), region = 93 }
 0x1b3   :  { %1556 = vsyncpa [#allocation3], 1 }
 0x1b4   :  { %1558 = vsyncpa [#allocation3 + $0x1], 1 }
 0x1b5   :  { %1559 = vsyncpa [#allocation6], 1 }
 0x1b6   :  { %1560 = vsyncpa [#allocation4], 1 }
 0x1b7   :  { %1562 = vsyncpa [#allocation4 + $0x1], 1 }

</bundles_post_ra>
